<compile_context>
chip_gen: v7x
topology: tpu7x:2x2x1
jax: 0.10.0
libtpu: 0.0.40
codegen_flags: <defaults>
</compile_context>

<pallas_src>
import jax
import jax.numpy as jnp
from jax.experimental import pallas as pl
from jax.experimental.pallas import tpu as pltpu

VMEM = pltpu.MemorySpace.VMEM
LANE = 128
MIN_ROWS = 16      # row granule for f32/bf16 sublane packing & MXU M-dim
BN_EPS = 1e-5      # torch.nn.BatchNorm1d default eps
NORM_EPS = 1e-12   # torch.nn.functional.normalize default eps


# --------------------------------------------------------------------------
# single fused kernel
# --------------------------------------------------------------------------
def byol_fused_kernel(x_ref, wc_ref, bc_ref, w1_ref, b1_ref, g1_ref, bt1_ref,
                      w2_ref, b2_ref, pg_ref, pbt_ref, pw2_ref, pb2_ref,
                      loss_ref):
    rows = x_ref.shape[0]
    inv_rows = 1.0 / rows

    def mm(a, w_ref):  # bf16 MXU operands, f32 accumulate
        return jnp.dot(a.astype(jnp.bfloat16), w_ref[...],
                       preferred_element_type=jnp.float32)

    def bn_relu(z, g, bt):
        # one-pass BatchNorm1d (training-mode batch stats) + ReLU, all in f32
        mu = jnp.sum(z, axis=0, keepdims=True) * inv_rows
        ez2 = jnp.sum(z * z, axis=0, keepdims=True) * inv_rows
        var = ez2 - mu * mu
        return jnp.maximum((z - mu) * jax.lax.rsqrt(var + BN_EPS) * g + bt, 0.0)

    def l2n(v):  # F.normalize(p=2, dim=-1, eps=1e-12) via EUP rsqrt
        ss = jnp.sum(v * v, axis=-1, keepdims=True)
        return v * jax.lax.rsqrt(jnp.maximum(ss, NORM_EPS * NORM_EPS))

    # --- fused online+target encoder: conv(Normalize folded) + flatten ------
    # lanes [0:128] = online hidden, lanes [128:256] = target hidden
    x = x_ref[...]                                        # (R, S*K) bf16
    h = mm(x, wc_ref) + bc_ref[...]                       # (R, 256) f32

    # --- fused projector: Linear -> BN -> ReLU (block-diagonal, 256 lanes) --
    z = bn_relu(mm(h, w1_ref) + b1_ref[...], g1_ref[...], bt1_ref[...])

    # --- block-diagonal second Linear:
    #     online half:  projector.W2 folded with predictor.W1 (exact)
    #     target half:  projector.W2  -> target projection
    y = mm(z, w2_ref) + b2_ref[...]                       # (R, 256) f32
    pred_pre = y[:, :LANE]                                # online predictor pre-BN
    tgt_proj = y[:, LANE:]                                # target projection

    # --- predictor tail: BN -> ReLU -> Linear -------------------------------
    zp = bn_relu(pred_pre, pg_ref[...], pbt_ref[...])
    pred = mm(zp, pw2_ref) + pb2_ref[...]                 # (R, 128) f32

    # --- symmetric BYOL loss -------------------------------------------------
    # image_one == image_two (deterministic augment) => loss_one == loss_two,
    # so (loss_one + loss_two).mean() == 2 * mean(per_row).  Replicated rows
    # are exact copies, so the mean over R rows equals the mean over B rows.
    # TODO(synk): stop_gradient on the target branch if this is differentiated.
    per_row = 2.0 - 2.0 * jnp.sum(l2n(pred) * l2n(tgt_proj), axis=-1,
                                  keepdims=True)          # (R, 1)
    loss_ref[...] = jnp.sum(per_row, axis=0, keepdims=True) * (2.0 * inv_rows)


# --------------------------------------------------------------------------
# one-time parameter folding / fusing / padding (hoisted off the step path)
# --------------------------------------------------------------------------
def _pad2(a, rows, cols):
    out = jnp.zeros((rows, cols), a.dtype)
    return out.at[: a.shape[0], : a.shape[1]].set(a)


def _prep_mlp(mlp_p):
    w1, b1, gamma, beta, w2, b2 = mlp_p
    return (_pad2(w1, LANE, LANE), _pad2(b1, 1, LANE), _pad2(gamma, 1, LANE),
            _pad2(beta, 1, LANE), _pad2(w2, LANE, LANE), _pad2(b2, 1, LANE))


def _prep_encoder(enc, mean, std, image_size, patch):
    conv_w, conv_b = enc["conv_w"], enc["conv_b"]
    cout, cin, p, _ = conv_w.shape
    K = cin * p * p
    S = (image_size // patch) ** 2
    # fold Normalize((x - mean) / std) into the conv weights / bias (exact)
    inv_std_k = jnp.repeat(1.0 / std, p * p)                  # (K,)
    mean_k = jnp.repeat(mean, p * p)                          # (K,)
    wc = conv_w.reshape(cout, K) * inv_std_k[None, :]
    bc = conv_b - jnp.sum(wc * mean_k[None, :], axis=1)
    # block-diagonal conv weight: one matmul of the per-image im2col row
    # (S*K wide) emits the flattened hidden layer (S*cout dense lanes).
    # NOTE: carries structural zeros (fine at S=16); revisit if S grows.
    wblk = jnp.kron(jnp.eye(S, dtype=jnp.float32), wc.T)      # (S*K, S*cout)
    bblk = jnp.tile(bc, S).reshape(1, S * cout)
    # permute projector W1 rows from PyTorch flatten order (cout-major) to the
    # spatial-major order produced by wblk -- mathematically identical result
    w1, b1, gamma, beta, w2, b2 = enc["proj"]
    dhid = w1.shape[1]
    w1p = w1.reshape(cout, S, dhid).transpose(1, 0, 2).reshape(S * cout, dhid)
    mlp = _prep_mlp((w1p, b1, gamma, beta, w2, b2))
    return (_pad2(wblk, S * K, LANE), _pad2(bblk, 1, LANE)) + mlp


def prepare_fused_params(params, image_size):
    mean, std, patch = params["mean"], params["std"], params["patch"]
    on = _prep_encoder(params["online"], mean, std, image_size, patch)
    tg = _prep_encoder(params["target"], mean, std, image_size, patch)
    pw1, pb1, pg, pbt, pw2, pb2 = _prep_mlp(params["predictor"])

    # fold online projector's final Linear into predictor's first Linear
    # (no nonlinearity between them -> exact)
    wf_on = jnp.dot(on[6], pw1)                               # (L, L)
    bf_on = jnp.dot(on[7], pw1) + pb1                         # (1, L)

    def block_diag(a, b):
        out = jnp.zeros((a.shape[0] + b.shape[0], a.shape[1] + b.shape[1]),
                        jnp.float32)
        out = out.at[: a.shape[0], : a.shape[1]].set(a)
        return out.at[a.shape[0]:, a.shape[1]:].set(b)

    args = (
        jnp.concatenate([on[0], tg[0]], axis=1).astype(jnp.bfloat16),  # conv W (S*K, 2L)
        jnp.concatenate([on[1], tg[1]], axis=1),                       # conv bias
        block_diag(on[2], tg[2]).astype(jnp.bfloat16),                 # proj W1 (2L, 2L)
        jnp.concatenate([on[3], tg[3]], axis=1),                       # proj b1
        jnp.concatenate([on[4], tg[4]], axis=1),                       # proj gamma
        jnp.concatenate([on[5], tg[5]], axis=1),                       # proj beta
        block_diag(wf_on, tg[6]).astype(jnp.bfloat16),                 # [projW2@predW1 | tgt projW2]
        jnp.concatenate([bf_on, tg[7]], axis=1),                       # fused bias
        pg, pbt,                                                       # predictor BN
        pw2.astype(jnp.bfloat16), pb2,                                 # predictor W2
    )
    return {"args": args, "patch": patch}


# --------------------------------------------------------------------------
# forward: im2col glue (pure data movement) + ONE pallas_call
# --------------------------------------------------------------------------
def _im2col(x, patch):
    B, cin, H, W = x.shape
    nh, nw = H // patch, W // patch
    xp = x.reshape(B, cin, nh, patch, nw, patch).transpose(0, 2, 4, 1, 3, 5)
    return xp.reshape(B, nh * nw * cin * patch * patch)       # (B, S*K)


def byol_forward(x, fused):
    # TODO(synk): RandomHorizontalFlip / RandomResizedCrop are stochastic data
    # augmentations and are omitted; the deterministic Normalize is folded into
    # the conv weights, so image_one == image_two == Normalize(x) and the
    # symmetric loss reduces exactly to 2 * loss_fn(pred, target).
    xp = _im2col(x, fused["patch"])                           # (B, S*K) f32
    b = xp.shape[0]
    # replicate rows to a sublane/MXU-friendly granule; exact replicas keep
    # BatchNorm batch statistics and the mean loss bit-identical.
    reps = max(1, -(-MIN_ROWS // b))
    xr = jnp.tile(xp, (reps, 1)).astype(jnp.bfloat16)         # (R, S*K) bf16
    args = (xr,) + fused["args"]
    loss = pl.pallas_call(
        byol_fused_kernel,
        out_shape=jax.ShapeDtypeStruct((1, 1), jnp.float32),
        in_specs=[pl.BlockSpec(memory_space=VMEM) for _ in args],
        out_specs=pl.BlockSpec(memory_space=VMEM),
    )(*args)
    # TODO(synk): when B scales beyond VMEM (esp. v7x's 64 MiB), add a batch
    # grid (weights as constant blocks), two-phase BN accumulation in scratch,
    # and set vmem_limit_bytes via pltpu.CompilerParams.
    return loss[0, 0]


# --------------------------------------------------------------------------
# deterministic parameter init (PyTorch-style uniform bounds)
# --------------------------------------------------------------------------
def init_params(key, image_size=16, cin=3, cout=8, patch=4,
                projection_size=32, projection_hidden_size=64):
    def lin(k, fin, fout):
        k1, k2 = jax.random.split(k)
        bound = 1.0 / jnp.sqrt(float(fin))
        w = jax.random.uniform(k1, (fin, fout), jnp.float32, -bound, bound)
        b = jax.random.uniform(k2, (1, fout), jnp.float32, -bound, bound)
        return w, b

    def mlp_params(k, din, dhid, dout):
        k1, k2 = jax.random.split(k)
        w1, b1 = lin(k1, din, dhid)
        w2, b2 = lin(k2, dhid, dout)
        gamma = jnp.ones((1, dhid), jnp.float32)
        beta = jnp.zeros((1, dhid), jnp.float32)
        return (w1, b1, gamma, beta, w2, b2)

    dim = cout * (image_size // patch) ** 2
    k_conv, k_cb, k_proj, k_pred = jax.random.split(key, 4)
    fan_in = cin * patch * patch
    bound = 1.0 / jnp.sqrt(float(fan_in))
    conv_w = jax.random.uniform(k_conv, (cout, cin, patch, patch),
                                jnp.float32, -bound, bound)
    conv_b = jax.random.uniform(k_cb, (cout,), jnp.float32, -bound, bound)

    online = {"conv_w": conv_w, "conv_b": conv_b,
              "proj": mlp_params(k_proj, dim, projection_hidden_size,
                                 projection_size)}
    # target encoder = deepcopy of online encoder at construction time
    # TODO(synk): EMA update of the target (update_moving_average) is a
    # training-step side effect, not part of forward(); omitted.
    target = jax.tree_util.tree_map(lambda a: a, online)
    predictor = mlp_params(k_pred, projection_size, projection_hidden_size,
                           projection_size)

    return {
        "online": online,
        "target": target,
        "predictor": predictor,
        "mean": jnp.array([0.485, 0.456, 0.406], jnp.float32),
        "std": jnp.array([0.229, 0.224, 0.225], jnp.float32),
        "patch": patch,
    }


if __name__ == "__main__":
    key = jax.random.PRNGKey(0)
    k_x, k_p = jax.random.split(key)
    image_size = 16
    params = init_params(k_p, image_size=image_size)
    fused = prepare_fused_params(params, image_size)           # one-time prep
    x = jax.random.normal(k_x, (2, 3, image_size, image_size), jnp.float32)

    fwd = jax.jit(lambda inp: byol_forward(inp, fused))
    loss = fwd(x)
    jax.block_until_ready(loss)
    print("KERNEL_OK")
</pallas_src>

<mosaic_0001>
module attributes {stable_mosaic.version = 11 : i64} {
  func.func @byol_fused_kernel(%arg0: memref<16x768xbf16, #tpu.memory_space<vmem>>, %arg1: memref<768x256xbf16, #tpu.memory_space<vmem>>, %arg2: memref<1x256xf32, #tpu.memory_space<vmem>>, %arg3: memref<256x256xbf16, #tpu.memory_space<vmem>>, %arg4: memref<1x256xf32, #tpu.memory_space<vmem>>, %arg5: memref<1x256xf32, #tpu.memory_space<vmem>>, %arg6: memref<1x256xf32, #tpu.memory_space<vmem>>, %arg7: memref<256x256xbf16, #tpu.memory_space<vmem>>, %arg8: memref<1x256xf32, #tpu.memory_space<vmem>>, %arg9: memref<1x128xf32, #tpu.memory_space<vmem>>, %arg10: memref<1x128xf32, #tpu.memory_space<vmem>>, %arg11: memref<128x128xbf16, #tpu.memory_space<vmem>>, %arg12: memref<1x128xf32, #tpu.memory_space<vmem>>, %arg13: memref<1x1xf32, #tpu.memory_space<vmem>>) attributes {dimension_semantics = [], scalar_prefetch = 0 : i64, scratch_operands = 0 : i64, tpu.core_type = #tpu.core_type<tc>} {
    %c0 = arith.constant 0 : index
    %c0_0 = arith.constant 0 : index
    %0 = vector.load %arg0[%c0, %c0_0] : memref<16x768xbf16, #tpu.memory_space<vmem>>, vector<16x768xbf16>
    %c0_1 = arith.constant 0 : index
    %c0_2 = arith.constant 0 : index
    %1 = vector.load %arg1[%c0_1, %c0_2] : memref<768x256xbf16, #tpu.memory_space<vmem>>, vector<768x256xbf16>
    %cst = arith.constant dense<0.000000e+00> : vector<16x256xf32>
    %2 = tpu.matmul %0, %1, %cst {dimension_numbers = #tpu.dot_dimension_numbers<[1], [0], [0], [1], [0, 0, 1, 1], [], []>} : vector<16x768xbf16>, vector<768x256xbf16>, vector<16x256xf32> -> vector<16x256xf32>
    %c0_3 = arith.constant 0 : index
    %c0_4 = arith.constant 0 : index
    %3 = vector.load %arg2[%c0_3, %c0_4] : memref<1x256xf32, #tpu.memory_space<vmem>>, vector<1x256xf32>
    %4 = vector.broadcast %3 : vector<1x256xf32> to vector<16x256xf32>
    %5 = arith.addf %2, %4 : vector<16x256xf32>
    %6 = arith.truncf %5 : vector<16x256xf32> to vector<16x256xbf16>
    %c0_5 = arith.constant 0 : index
    %c0_6 = arith.constant 0 : index
    %7 = vector.load %arg3[%c0_5, %c0_6] : memref<256x256xbf16, #tpu.memory_space<vmem>>, vector<256x256xbf16>
    %cst_7 = arith.constant dense<0.000000e+00> : vector<16x256xf32>
    %8 = tpu.matmul %6, %7, %cst_7 {dimension_numbers = #tpu.dot_dimension_numbers<[1], [0], [0], [1], [0, 0, 1, 1], [], []>} : vector<16x256xbf16>, vector<256x256xbf16>, vector<16x256xf32> -> vector<16x256xf32>
    %c0_8 = arith.constant 0 : index
    %c0_9 = arith.constant 0 : index
    %9 = vector.load %arg4[%c0_8, %c0_9] : memref<1x256xf32, #tpu.memory_space<vmem>>, vector<1x256xf32>
    %10 = vector.broadcast %9 : vector<1x256xf32> to vector<16x256xf32>
    %11 = arith.addf %8, %10 : vector<16x256xf32>
    %c0_10 = arith.constant 0 : index
    %c0_11 = arith.constant 0 : index
    %12 = vector.load %arg5[%c0_10, %c0_11] : memref<1x256xf32, #tpu.memory_space<vmem>>, vector<1x256xf32>
    %c0_12 = arith.constant 0 : index
    %c0_13 = arith.constant 0 : index
    %13 = vector.load %arg6[%c0_12, %c0_13] : memref<1x256xf32, #tpu.memory_space<vmem>>, vector<1x256xf32>
    %cst_14 = arith.constant dense<0.000000e+00> : vector<256xf32>
    %14 = vector.multi_reduction <add>, %11, %cst_14 [0] : vector<16x256xf32> to vector<256xf32>
    %15 = vector.shape_cast %14 : vector<256xf32> to vector<1x256xf32>
    %cst_15 = arith.constant 6.250000e-02 : f32
    %16 = vector.broadcast %cst_15 : f32 to vector<1x256xf32>
    %17 = arith.mulf %15, %16 : vector<1x256xf32>
    %18 = arith.mulf %11, %11 : vector<16x256xf32>
    %cst_16 = arith.constant dense<0.000000e+00> : vector<256xf32>
    %19 = vector.multi_reduction <add>, %18, %cst_16 [0] : vector<16x256xf32> to vector<256xf32>
    %20 = vector.shape_cast %19 : vector<256xf32> to vector<1x256xf32>
    %cst_17 = arith.constant 6.250000e-02 : f32
    %21 = vector.broadcast %cst_17 : f32 to vector<1x256xf32>
    %22 = arith.mulf %20, %21 : vector<1x256xf32>
    %23 = arith.mulf %17, %17 : vector<1x256xf32>
    %24 = arith.subf %22, %23 : vector<1x256xf32>
    %25 = vector.broadcast %17 : vector<1x256xf32> to vector<16x256xf32>
    %26 = arith.subf %11, %25 : vector<16x256xf32>
    %cst_18 = arith.constant 9.99999974E-6 : f32
    %27 = vector.broadcast %cst_18 : f32 to vector<1x256xf32>
    %28 = arith.addf %24, %27 : vector<1x256xf32>
    %29 = math.rsqrt %28 : vector<1x256xf32>
    %30 = vector.broadcast %29 : vector<1x256xf32> to vector<16x256xf32>
    %31 = arith.mulf %26, %30 : vector<16x256xf32>
    %32 = vector.broadcast %12 : vector<1x256xf32> to vector<16x256xf32>
    %33 = arith.mulf %31, %32 : vector<16x256xf32>
    %34 = vector.broadcast %13 : vector<1x256xf32> to vector<16x256xf32>
    %35 = arith.addf %33, %34 : vector<16x256xf32>
    %cst_19 = arith.constant 0.000000e+00 : f32
    %36 = vector.broadcast %cst_19 : f32 to vector<16x256xf32>
    %37 = arith.maximumf %35, %36 : vector<16x256xf32>
    %38 = arith.truncf %37 : vector<16x256xf32> to vector<16x256xbf16>
    %c0_20 = arith.constant 0 : index
    %c0_21 = arith.constant 0 : index
    %39 = vector.load %arg7[%c0_20, %c0_21] : memref<256x256xbf16, #tpu.memory_space<vmem>>, vector<256x256xbf16>
    %cst_22 = arith.constant dense<0.000000e+00> : vector<16x256xf32>
    %40 = tpu.matmul %38, %39, %cst_22 {dimension_numbers = #tpu.dot_dimension_numbers<[1], [0], [0], [1], [0, 0, 1, 1], [], []>} : vector<16x256xbf16>, vector<256x256xbf16>, vector<16x256xf32> -> vector<16x256xf32>
    %c0_23 = arith.constant 0 : index
    %c0_24 = arith.constant 0 : index
    %41 = vector.load %arg8[%c0_23, %c0_24] : memref<1x256xf32, #tpu.memory_space<vmem>>, vector<1x256xf32>
    %42 = vector.broadcast %41 : vector<1x256xf32> to vector<16x256xf32>
    %43 = arith.addf %40, %42 : vector<16x256xf32>
    %44 = vector.extract_strided_slice %43 {offsets = [0, 0], sizes = [16, 128], strides = [1, 1]} : vector<16x256xf32> to vector<16x128xf32>
    %45 = vector.extract_strided_slice %43 {offsets = [0, 128], sizes = [16, 128], strides = [1, 1]} : vector<16x256xf32> to vector<16x128xf32>
    %c0_25 = arith.constant 0 : index
    %c0_26 = arith.constant 0 : index
    %46 = vector.load %arg9[%c0_25, %c0_26] : memref<1x128xf32, #tpu.memory_space<vmem>>, vector<1x128xf32>
    %c0_27 = arith.constant 0 : index
    %c0_28 = arith.constant 0 : index
    %47 = vector.load %arg10[%c0_27, %c0_28] : memref<1x128xf32, #tpu.memory_space<vmem>>, vector<1x128xf32>
    %cst_29 = arith.constant dense<0.000000e+00> : vector<128xf32>
    %48 = vector.multi_reduction <add>, %44, %cst_29 [0] : vector<16x128xf32> to vector<128xf32>
    %49 = vector.shape_cast %48 : vector<128xf32> to vector<1x128xf32>
    %cst_30 = arith.constant 6.250000e-02 : f32
    %50 = vector.broadcast %cst_30 : f32 to vector<1x128xf32>
    %51 = arith.mulf %49, %50 : vector<1x128xf32>
    %52 = arith.mulf %44, %44 : vector<16x128xf32>
    %cst_31 = arith.constant dense<0.000000e+00> : vector<128xf32>
    %53 = vector.multi_reduction <add>, %52, %cst_31 [0] : vector<16x128xf32> to vector<128xf32>
    %54 = vector.shape_cast %53 : vector<128xf32> to vector<1x128xf32>
    %cst_32 = arith.constant 6.250000e-02 : f32
    %55 = vector.broadcast %cst_32 : f32 to vector<1x128xf32>
    %56 = arith.mulf %54, %55 : vector<1x128xf32>
    %57 = arith.mulf %51, %51 : vector<1x128xf32>
    %58 = arith.subf %56, %57 : vector<1x128xf32>
    %59 = vector.broadcast %51 : vector<1x128xf32> to vector<16x128xf32>
    %60 = arith.subf %44, %59 : vector<16x128xf32>
    %cst_33 = arith.constant 9.99999974E-6 : f32
    %61 = vector.broadcast %cst_33 : f32 to vector<1x128xf32>
    %62 = arith.addf %58, %61 : vector<1x128xf32>
    %63 = math.rsqrt %62 : vector<1x128xf32>
    %64 = vector.broadcast %63 : vector<1x128xf32> to vector<16x128xf32>
    %65 = arith.mulf %60, %64 : vector<16x128xf32>
    %66 = vector.broadcast %46 : vector<1x128xf32> to vector<16x128xf32>
    %67 = arith.mulf %65, %66 : vector<16x128xf32>
    %68 = vector.broadcast %47 : vector<1x128xf32> to vector<16x128xf32>
    %69 = arith.addf %67, %68 : vector<16x128xf32>
    %cst_34 = arith.constant 0.000000e+00 : f32
    %70 = vector.broadcast %cst_34 : f32 to vector<16x128xf32>
    %71 = arith.maximumf %69, %70 : vector<16x128xf32>
    %72 = arith.truncf %71 : vector<16x128xf32> to vector<16x128xbf16>
    %c0_35 = arith.constant 0 : index
    %c0_36 = arith.constant 0 : index
    %73 = vector.load %arg11[%c0_35, %c0_36] : memref<128x128xbf16, #tpu.memory_space<vmem>>, vector<128x128xbf16>
    %cst_37 = arith.constant dense<0.000000e+00> : vector<16x128xf32>
    %74 = tpu.matmul %72, %73, %cst_37 {dimension_numbers = #tpu.dot_dimension_numbers<[1], [0], [0], [1], [0, 0, 1, 1], [], []>} : vector<16x128xbf16>, vector<128x128xbf16>, vector<16x128xf32> -> vector<16x128xf32>
    %c0_38 = arith.constant 0 : index
    %c0_39 = arith.constant 0 : index
    %75 = vector.load %arg12[%c0_38, %c0_39] : memref<1x128xf32, #tpu.memory_space<vmem>>, vector<1x128xf32>
    %76 = vector.broadcast %75 : vector<1x128xf32> to vector<16x128xf32>
    %77 = arith.addf %74, %76 : vector<16x128xf32>
    %78 = arith.mulf %77, %77 : vector<16x128xf32>
    %cst_40 = arith.constant dense<0.000000e+00> : vector<16xf32>
    %79 = vector.multi_reduction <add>, %78, %cst_40 [1] : vector<16x128xf32> to vector<16xf32>
    %80 = vector.shape_cast %79 : vector<16xf32> to vector<16x1xf32>
    %cst_41 = arith.constant 1.000000e-24 : f32
    %81 = vector.broadcast %cst_41 : f32 to vector<16x1xf32>
    %82 = arith.maximumf %80, %81 : vector<16x1xf32>
    %83 = math.rsqrt %82 : vector<16x1xf32>
    %84 = vector.broadcast %83 : vector<16x1xf32> to vector<16x128xf32>
    %85 = arith.mulf %77, %84 : vector<16x128xf32>
    %86 = arith.mulf %45, %45 : vector<16x128xf32>
    %cst_42 = arith.constant dense<0.000000e+00> : vector<16xf32>
    %87 = vector.multi_reduction <add>, %86, %cst_42 [1] : vector<16x128xf32> to vector<16xf32>
    %88 = vector.shape_cast %87 : vector<16xf32> to vector<16x1xf32>
    %cst_43 = arith.constant 1.000000e-24 : f32
    %89 = vector.broadcast %cst_43 : f32 to vector<16x1xf32>
    %90 = arith.maximumf %88, %89 : vector<16x1xf32>
    %91 = math.rsqrt %90 : vector<16x1xf32>
    %92 = vector.broadcast %91 : vector<16x1xf32> to vector<16x128xf32>
    %93 = arith.mulf %45, %92 : vector<16x128xf32>
    %94 = arith.mulf %85, %93 : vector<16x128xf32>
    %cst_44 = arith.constant dense<0.000000e+00> : vector<16xf32>
    %95 = vector.multi_reduction <add>, %94, %cst_44 [1] : vector<16x128xf32> to vector<16xf32>
    %96 = vector.shape_cast %95 : vector<16xf32> to vector<16x1xf32>
    %cst_45 = arith.constant 2.000000e+00 : f32
    %97 = vector.broadcast %cst_45 : f32 to vector<16x1xf32>
    %98 = arith.mulf %97, %96 : vector<16x1xf32>
    %cst_46 = arith.constant 2.000000e+00 : f32
    %99 = vector.broadcast %cst_46 : f32 to vector<16x1xf32>
    %100 = arith.subf %99, %98 : vector<16x1xf32>
    %cst_47 = arith.constant dense<0.000000e+00> : vector<1xf32>
    %101 = vector.multi_reduction <add>, %100, %cst_47 [0] : vector<16x1xf32> to vector<1xf32>
    %102 = vector.shape_cast %101 : vector<1xf32> to vector<1x1xf32>
    %cst_48 = arith.constant 1.250000e-01 : f32
    %103 = vector.broadcast %cst_48 : f32 to vector<1x1xf32>
    %104 = arith.mulf %102, %103 : vector<1x1xf32>
    %c0_49 = arith.constant 0 : index
    %c0_50 = arith.constant 0 : index
    %105 = vector.load %arg13[%c0_49, %c0_50] : memref<1x1xf32, #tpu.memory_space<vmem>>, vector<1x1xf32>
    tpu.vector_store %arg13[%c0_49, %c0_50], %104 {strides = array<i32>} : memref<1x1xf32, #tpu.memory_space<vmem>>, vector<1x1xf32>,
    return
  }
}

</mosaic_0001>

<bundles_post_ra>
// kernel: _lambda_.1
= control target key start
LH: loop header
LB: loop body
LE: loop exit
PB: predicated region body
PF: predicated region fallthrough
CT: control target
= control target key end

     0   :  { %s2785_s0 = inlined_call_operand.vmem [shape: bf16[16,768], index: 0, kind: input, shape index: {}]   ;;  %s2786_s1 = inlined_call_operand.vmem [shape: bf16[768,256], index: 1, kind: input, shape index: {}]   ;;  %s2787_s2 = inlined_call_operand.vmem [shape: f32[1,256], index: 2, kind: input, shape index: {}]   ;;  %s2788_s3 = inlined_call_operand.vmem [shape: bf16[256,256], index: 3, kind: input, shape index: {}]   ;;  %s2789_s4 = inlined_call_operand.vmem [shape: f32[1,256], index: 4, kind: input, shape index: {}]   ;;  %s2790_s5 = inlined_call_operand.vmem [shape: f32[1,256], index: 5, kind: input, shape index: {}]   ;;  %s2791_s6 = inlined_call_operand.vmem [shape: f32[1,256], index: 6, kind: input, shape index: {}]   ;;  %s2792_s7 = inlined_call_operand.vmem [shape: bf16[256,256], index: 7, kind: input, shape index: {}]   ;;  %s2793_s8 = inlined_call_operand.vmem [shape: f32[1,256], index: 8, kind: input, shape index: {}]   ;;  %s2794_s9 = inlined_call_operand.vmem [shape: f32[1,128], index: 9, kind: input, shape index: {}]   ;;  %s2795_s10 = inlined_call_operand.vmem [shape: f32[1,128], index: 10, kind: input, shape index: {}]   ;;  %s2796_s11 = inlined_call_operand.vmem [shape: bf16[128,128], index: 11, kind: input, shape index: {}]   ;;  %s2797_s12 = inlined_call_operand.vmem [shape: f32[1,128], index: 12, kind: input, shape index: {}]   ;;  %s2798_s13 = inlined_call_operand.hbm [shape: f32[1,1], index: 13, kind: output, shape index: {}]  }
   0x1   :  { %v1823_v0 = vld [vmem:[%s2786_s1 + $0x4] ss:$8 sps:$4 sm:$0xff]   ;;  %v1825_v1 = vld [vmem:[%s2786_s1] ss:$8 sps:$4 sm:$0xff]   ;;  %v1826_v2 = vld [vmem:[%s2786_s1 + $0x14] ss:$8 sps:$4 sm:$0xff]  }
   0x2   :  { %670 = vmatprep.subr.bf16.mxu0 %v1823_v0  ;;  %v1828_v3 = vld [vmem:[%s2786_s1 + $0x10] ss:$8 sps:$4 sm:$0xff]   ;;  %v1829_v4 = vld [vmem:[%s2786_s1 + $0x24] ss:$8 sps:$4 sm:$0xff]   ;;  %v1831_v5 = vld [vmem:[%s2786_s1 + $0x20] ss:$8 sps:$4 sm:$0xff]  }
   0x3   :  { %671 = vmatpush1.bf16.msra.mxu0 %v1825_v1  ;;  %v1832_v6 = vld [vmem:[%s2786_s1 + $0x34] ss:$8 sps:$4 sm:$0xff]   ;;  %v1834_v7 = vld [vmem:[%s2786_s1 + $0x30] ss:$8 sps:$4 sm:$0xff]   ;;  %v1835_v8 = vld [vmem:[%s2786_s1 + $0x44] ss:$8 sps:$4 sm:$0xff]  }
   0x4   :  { %672 = vmatprep.subr.bf16.mxu0 %v1826_v2  ;;  %v1837_v9 = vld [vmem:[%s2786_s1 + $0x40] ss:$8 sps:$4 sm:$0xff]   ;;  %v1838_v10 = vld [vmem:[%s2786_s1 + $0x54] ss:$8 sps:$4 sm:$0xff]   ;;  %v1840_v11 = vld [vmem:[%s2786_s1 + $0x50] ss:$8 sps:$4 sm:$0xff]  }
   0x5   :  { %v1841_v12 = vld [vmem:[%s2786_s1 + $0x64] ss:$8 sps:$4 sm:$0xff]   ;;  %v1843_v14 = vld [vmem:[%s2786_s1 + $0x60] ss:$8 sps:$4 sm:$0xff]   ;;  %v1844_v15 = vld [vmem:[%s2786_s1 + $0x74] ss:$8 sps:$4 sm:$0xff]  }
   0x6   :  { %v1873_v13 = vld [vmem:[%s2785_s0 + $0x4] ss:$24 sps:$4 sm:$0xff]   ;;  %v1846_v16 = vld [vmem:[%s2786_s1 + $0x70] ss:$8 sps:$4 sm:$0xff]   ;;  %v1849_v18 = vld [vmem:[%s2786_s1 + $0x80] ss:$8 sps:$4 sm:$0xff]  }
   0x7   :  { %673 = vmatpush1.bf16.msra.mxu0 %v1828_v3  ;;  %702 = vmatprep.mubr.bf16.mxu0 %v1873_v13  ;;  %v1847_v17 = vld [vmem:[%s2786_s1 + $0x84] ss:$8 sps:$4 sm:$0xff]   ;;  %v1850_v19 = vld [vmem:[%s2786_s1 + $0x94] ss:$8 sps:$4 sm:$0xff]   ;;  %v1852_v20 = vld [vmem:[%s2786_s1 + $0x90] ss:$8 sps:$4 sm:$0xff]  }
   0x8   :  { %674 = vmatprep.subr.bf16.mxu0 %v1829_v4  ;;  %v1853_v21 = vld [vmem:[%s2786_s1 + $0xa4] ss:$8 sps:$4 sm:$0xff]   ;;  %v1855_v22 = vld [vmem:[%s2786_s1 + $0xa0] ss:$8 sps:$4 sm:$0xff]   ;;  %v1856_v23 = vld [vmem:[%s2786_s1 + $0xb4] ss:$8 sps:$4 sm:$0xff]  }
   0x9   :  { %v1858_v24 = vld [vmem:[%s2786_s1 + $0xb0] ss:$8 sps:$4 sm:$0xff]   ;;  %v1859_v25 = vld [vmem:[%s2786_s1 + $0xc4] ss:$8 sps:$4 sm:$0xff]   ;;  %v1861_v26 = vld [vmem:[%s2786_s1 + $0xc0] ss:$8 sps:$4 sm:$0xff]  }
   0xa   :  { %v1862_v27 = vld [vmem:[%s2786_s1 + $0xd4] ss:$8 sps:$4 sm:$0xff]   ;;  %v1864_v28 = vld [vmem:[%s2786_s1 + $0xd0] ss:$8 sps:$4 sm:$0xff]   ;;  %v1865_v29 = vld [vmem:[%s2786_s1 + $0xe4] ss:$8 sps:$4 sm:$0xff]  }
   0xb   :  { %675 = vmatpush1.bf16.msra.mxu0 %v1831_v5  ;;  %v1867_v30 = vld [vmem:[%s2786_s1 + $0xe0] ss:$8 sps:$4 sm:$0xff]   ;;  %v1868_v31 = vld [vmem:[%s2786_s1 + $0xf4] ss:$8 sps:$4 sm:$0xff]   ;;  %v1870_v32 = vld [vmem:[%s2786_s1 + $0xf0] ss:$8 sps:$4 sm:$0xff]  }
   0xc   :  { %676 = vmatprep.subr.bf16.mxu0 %v1832_v6  ;;  %v1876_v33 = vld [vmem:[%s2786_s1 + $0x104] ss:$8 sps:$4 sm:$0xff]   ;;  %v1871_v34 = vld [vmem:[%s2785_s0] ss:$24 sps:$4 sm:$0xff]   ;;  %v1879_v37 = vld [vmem:[%s2786_s1 + $0x114] ss:$8 sps:$4 sm:$0xff]  }
   0xd   :  { %v1874_v35 = vld [vmem:[%s2786_s1 + $0x100] ss:$8 sps:$4 sm:$0xff]   ;;  %v1924_v36 = vld [vmem:[%s2785_s0 + $0xc] ss:$24 sps:$4 sm:$0xff]   ;;  %v1877_v38 = vld [vmem:[%s2786_s1 + $0x110] ss:$8 sps:$4 sm:$0xff]  }
   0xe   :  { %v1882_v39 = vld [vmem:[%s2786_s1 + $0x124] ss:$8 sps:$4 sm:$0xff]   ;;  %v1978_v41 = vld [vmem:[%s2788_s3] ss:$8 sps:$4 sm:$0xff]   ;;  %v1979_v43 = vld [vmem:[%s2788_s3 + $0x14] ss:$8 sps:$4 sm:$0xff]  }
   0xf   :  { %677 = vmatpush1.bf16.msra.mxu0 %v1834_v7  ;;  %v1976_v40 = vld [vmem:[%s2788_s3 + $0x4] ss:$8 sps:$4 sm:$0xff]   ;;  %v1880_v42 = vld [vmem:[%s2786_s1 + $0x120] ss:$8 sps:$4 sm:$0xff]   ;;  %v1885_v44 = vld [vmem:[%s2786_s1 + $0x134] ss:$8 sps:$4 sm:$0xff]  }
  0x10   :  { %678 = vmatprep.subr.bf16.mxu0 %v1835_v8  ;;  %1005 = vmatprep.subr.bf16.mxu1 %v1976_v40  ;;  %v1981_v45 = vld [vmem:[%s2788_s3 + $0x10] ss:$8 sps:$4 sm:$0xff]   ;;  %v1982_v46 = vld [vmem:[%s2788_s3 + $0x24] ss:$8 sps:$4 sm:$0xff]   ;;  %v1984_v49 = vld [vmem:[%s2788_s3 + $0x20] ss:$8 sps:$4 sm:$0xff]  }
  0x11   :  { %1006 = vmatpush1.bf16.msra.mxu1 %v1978_v41  ;;  %v1883_v47 = vld [vmem:[%s2786_s1 + $0x130] ss:$8 sps:$4 sm:$0xff]   ;;  %v1888_v48 = vld [vmem:[%s2786_s1 + $0x144] ss:$8 sps:$4 sm:$0xff]   ;;  %v1985_v50 = vld [vmem:[%s2788_s3 + $0x34] ss:$8 sps:$4 sm:$0xff]  }
  0x12   :  { %1007 = vmatprep.subr.bf16.mxu1 %v1979_v43  ;;  %v1886_v51 = vld [vmem:[%s2786_s1 + $0x140] ss:$8 sps:$4 sm:$0xff]   ;;  %v1891_v52 = vld [vmem:[%s2786_s1 + $0x154] ss:$8 sps:$4 sm:$0xff]   ;;  %v1987_v53 = vld [vmem:[%s2788_s3 + $0x30] ss:$8 sps:$4 sm:$0xff]  }
  0x13   :  { %679 = vmatpush1.bf16.msra.mxu0 %v1837_v9  ;;  %v1988_v54 = vld [vmem:[%s2788_s3 + $0x44] ss:$8 sps:$4 sm:$0xff]   ;;  %v1889_v55 = vld [vmem:[%s2786_s1 + $0x150] ss:$8 sps:$4 sm:$0xff]   ;;  %v1990_v57 = vld [vmem:[%s2788_s3 + $0x40] ss:$8 sps:$4 sm:$0xff]  }
  0x14   :  { %680 = vmatprep.subr.bf16.mxu0 %v1838_v10  ;;  %v1894_v56 = vld [vmem:[%s2786_s1 + $0x164] ss:$8 sps:$4 sm:$0xff]   ;;  %v1991_v58 = vld [vmem:[%s2788_s3 + $0x54] ss:$8 sps:$4 sm:$0xff]   ;;  %v1892_v59 = vld [vmem:[%s2786_s1 + $0x160] ss:$8 sps:$4 sm:$0xff]  }
  0x15   :  { %1008 = vmatpush1.bf16.msra.mxu1 %v1981_v45  ;;  %v1897_v60 = vld [vmem:[%s2786_s1 + $0x174] ss:$8 sps:$4 sm:$0xff]   ;;  %v1993_v61 = vld [vmem:[%s2788_s3 + $0x50] ss:$8 sps:$4 sm:$0xff]   ;;  %v1994_v62 = vld [vmem:[%s2788_s3 + $0x64] ss:$8 sps:$4 sm:$0xff]  }
  0x16   :  { %1009 = vmatprep.subr.bf16.mxu1 %v1982_v46  ;;  %v1895_v63 = vld [vmem:[%s2786_s1 + $0x170] ss:$8 sps:$4 sm:$0xff]   ;;  %v1996_v0 = vld [vmem:[%s2788_s3 + $0x60] ss:$8 sps:$4 sm:$0xff]   ;;  %v1900_v1 = vld [vmem:[%s2786_s1 + $0x184] ss:$8 sps:$4 sm:$0xff]  }
  0x17   :  { %681 = vmatpush1.bf16.msra.mxu0 %v1840_v11  ;;  %v1997_v2 = vld [vmem:[%s2788_s3 + $0x74] ss:$8 sps:$4 sm:$0xff]   ;;  %v1898_v3 = vld [vmem:[%s2786_s1 + $0x180] ss:$8 sps:$4 sm:$0xff]   ;;  %v1999_v4 = vld [vmem:[%s2788_s3 + $0x70] ss:$8 sps:$4 sm:$0xff]  }
  0x18   :  { %682 = vmatprep.subr.bf16.mxu0 %v1841_v12  ;;  %v1903_v5 = vld [vmem:[%s2786_s1 + $0x194] ss:$8 sps:$4 sm:$0xff]   ;;  %v2000_v6 = vld [vmem:[%s2788_s3 + $0x84] ss:$8 sps:$4 sm:$0xff]   ;;  %v1901_v7 = vld [vmem:[%s2786_s1 + $0x190] ss:$8 sps:$4 sm:$0xff]  }
  0x19   :  { %1010 = vmatpush1.bf16.msra.mxu1 %v1984_v49  ;;  %v2002_v8 = vld [vmem:[%s2788_s3 + $0x80] ss:$8 sps:$4 sm:$0xff]   ;;  %v1906_v9 = vld [vmem:[%s2786_s1 + $0x1a4] ss:$8 sps:$4 sm:$0xff]   ;;  %v2003_v10 = vld [vmem:[%s2788_s3 + $0x94] ss:$8 sps:$4 sm:$0xff]  }
  0x1a   :  { %1011 = vmatprep.subr.bf16.mxu1 %v1985_v50  ;;  %v1904_v11 = vld [vmem:[%s2786_s1 + $0x1a0] ss:$8 sps:$4 sm:$0xff]   ;;  %v2005_v12 = vld [vmem:[%s2788_s3 + $0x90] ss:$8 sps:$4 sm:$0xff]   ;;  %v1909_v13 = vld [vmem:[%s2786_s1 + $0x1b4] ss:$8 sps:$4 sm:$0xff]  }
  0x1b   :  { %683 = vmatpush1.bf16.msra.mxu0 %v1843_v14  ;;  %v2006_v14 = vld [vmem:[%s2788_s3 + $0xa4] ss:$8 sps:$4 sm:$0xff]  }
  0x1c   :  { %684 = vmatprep.subr.bf16.mxu0 %v1844_v15 }
  0x1d   :  { %1012 = vmatpush1.bf16.msra.mxu1 %v1987_v53 }
  0x1e   :  { %1013 = vmatprep.subr.bf16.mxu1 %v1988_v54 }
  0x1f   :  { %685 = vmatpush1.bf16.msra.mxu0 %v1846_v16 }
  0x20   :  { %686 = vmatprep.subr.bf16.mxu0 %v1847_v17 }
  0x21   :  { %1014 = vmatpush1.bf16.msra.mxu1 %v1990_v57 }
  0x22   :  { %1015 = vmatprep.subr.bf16.mxu1 %v1991_v58 }
  0x23   :  { %687 = vmatpush1.bf16.msra.mxu0 %v1849_v18 }
  0x24   :  { %688 = vmatprep.subr.bf16.mxu0 %v1850_v19 }
  0x25   :  { %1016 = vmatpush1.bf16.msra.mxu1 %v1993_v61 }
  0x26   :  { %1017 = vmatprep.subr.bf16.mxu1 %v1994_v62 }
  0x27   :  { %689 = vmatpush1.bf16.msra.mxu0 %v1852_v20 }
  0x28   :  { %690 = vmatprep.subr.bf16.mxu0 %v1853_v21 }
  0x29   :  { %1018 = vmatpush1.bf16.msra.mxu1 %v1996_v0 }
  0x2a   :  { %1019 = vmatprep.subr.bf16.mxu1 %v1997_v2 }
  0x2b   :  { %691 = vmatpush1.bf16.msra.mxu0 %v1855_v22 }
  0x2c   :  { %692 = vmatprep.subr.bf16.mxu0 %v1856_v23 }
  0x2d   :  { %1020 = vmatpush1.bf16.msra.mxu1 %v1999_v4 }
  0x2e   :  { %1021 = vmatprep.subr.bf16.mxu1 %v2000_v6 }
  0x2f   :  { %693 = vmatpush1.bf16.msra.mxu0 %v1858_v24 }
  0x30   :  { %694 = vmatprep.subr.bf16.mxu0 %v1859_v25 }
  0x31   :  { %1022 = vmatpush1.bf16.msra.mxu1 %v2002_v8 }
  0x32   :  { %1023 = vmatprep.subr.bf16.mxu1 %v2003_v10 }
  0x33   :  { %695 = vmatpush1.bf16.msra.mxu0 %v1861_v26 }
  0x34   :  { %696 = vmatprep.subr.bf16.mxu0 %v1862_v27 }
  0x37   :  { %697 = vmatpush1.bf16.msra.mxu0 %v1864_v28 }
  0x38   :  { %698 = vmatprep.subr.bf16.mxu0 %v1865_v29 }
  0x3b   :  { %699 = vmatpush1.bf16.msra.mxu0 %v1867_v30 }
  0x3c   :  { %700 = vmatprep.subr.bf16.mxu0 %v1868_v31 }
  0x3f   :  { %701 = vmatpush1.bf16.msra.mxu0 %v1870_v32 }
  0x40   :  { %713 = vmatprep.subr.bf16.mxu0 %v1876_v33 }
  0x42   :  { %703 = vmatmul.mubr.bf16.vlgmr.msra.gmra.mrb[0].mxu0 %v1871_v34 }
  0x43   :  { %714 = vmatpush1.bf16.msra.mxu0 %v1874_v35  ;;  %745 = vmatprep.mubr.bf16.mxu0 %v1924_v36 }
  0x44   :  { %715 = vmatprep.subr.bf16.mxu0 %v1879_v37 }
  0x47   :  { %716 = vmatpush1.bf16.msra.mxu0 %v1877_v38 }
  0x48   :  { %717 = vmatprep.subr.bf16.mxu0 %v1882_v39 }
  0x4b   :  { %718 = vmatpush1.bf16.msra.mxu0 %v1880_v42 }
  0x4c   :  { %719 = vmatprep.subr.bf16.mxu0 %v1885_v44 }
  0x4f   :  { %720 = vmatpush1.bf16.msra.mxu0 %v1883_v47 }
  0x50   :  { %721 = vmatprep.subr.bf16.mxu0 %v1888_v48 }
  0x53   :  { %722 = vmatpush1.bf16.msra.mxu0 %v1886_v51 }
  0x54   :  { %723 = vmatprep.subr.bf16.mxu0 %v1891_v52 }
  0x57   :  { %724 = vmatpush1.bf16.msra.mxu0 %v1889_v55 }
  0x58   :  { %725 = vmatprep.subr.bf16.mxu0 %v1894_v56 }
  0x5b   :  { %726 = vmatpush1.bf16.msra.mxu0 %v1892_v59 }
  0x5c   :  { %727 = vmatprep.subr.bf16.mxu0 %v1897_v60 }
  0x5f   :  { %728 = vmatpush1.bf16.msra.mxu0 %v1895_v63 }
  0x60   :  { %729 = vmatprep.subr.bf16.mxu0 %v1900_v1 }
  0x63   :  { %730 = vmatpush1.bf16.msra.mxu0 %v1898_v3 }
  0x64   :  { %731 = vmatprep.subr.bf16.mxu0 %v1903_v5 }
  0x67   :  { %732 = vmatpush1.bf16.msra.mxu0 %v1901_v7 }
  0x68   :  { %733 = vmatprep.subr.bf16.mxu0 %v1906_v9 }
  0x69   :  { %18 = vsyncpa [#allocation3], 0  ;;  %v1907_v15 = vld [vmem:[%s2786_s1 + $0x1b0] ss:$8 sps:$4 sm:$0xff]   ;;  %1024 = vmatpush1.bf16.msra.mxu1 %v2005_v12  ;;  %v2008_v16 = vld [vmem:[%s2788_s3 + $0xa0] ss:$8 sps:$4 sm:$0xff]   ;;  %v150_v7 = vlaneseq }
  0x6a   :  { %v1912_v17 = vld [vmem:[%s2786_s1 + $0x1c4] ss:$8 sps:$4 sm:$0xff]   ;;  %1025 = vmatprep.subr.bf16.mxu1 %v2006_v14  ;;  %v2009_v18 = vld [vmem:[%s2788_s3 + $0xb4] ss:$8 sps:$4 sm:$0xff]   ;;  %v1910_v19 = vld [vmem:[%s2786_s1 + $0x1c0] ss:$8 sps:$4 sm:$0xff]  }
  0x6b   :  { %734 = vmatpush1.bf16.msra.mxu0 %v1904_v11  ;;  %v2011_v20 = vld [vmem:[%s2788_s3 + $0xb0] ss:$8 sps:$4 sm:$0xff]   ;;  %v1915_v21 = vld [vmem:[%s2786_s1 + $0x1d4] ss:$8 sps:$4 sm:$0xff]   ;;  %v2012_v22 = vld [vmem:[%s2788_s3 + $0xc4] ss:$8 sps:$4 sm:$0xff]  }
  0x6c   :  { %735 = vmatprep.subr.bf16.mxu0 %v1909_v13  ;;  %v1913_v23 = vld [vmem:[%s2786_s1 + $0x1d0] ss:$8 sps:$4 sm:$0xff]   ;;  %v2014_v24 = vld [vmem:[%s2788_s3 + $0xc0] ss:$8 sps:$4 sm:$0xff]   ;;  %v1918_v25 = vld [vmem:[%s2786_s1 + $0x1e4] ss:$8 sps:$4 sm:$0xff]  }
  0x6d   :  { %1026 = vmatpush1.bf16.msra.mxu1 %v2008_v16  ;;  %v2015_v26 = vld [vmem:[%s2788_s3 + $0xd4] ss:$8 sps:$4 sm:$0xff]   ;;  %v1916_v27 = vld [vmem:[%s2786_s1 + $0x1e0] ss:$8 sps:$4 sm:$0xff]   ;;  %v2017_v28 = vld [vmem:[%s2788_s3 + $0xd0] ss:$8 sps:$4 sm:$0xff]  }
  0x6e   :  { %1027 = vmatprep.subr.bf16.mxu1 %v2009_v18  ;;  %v1921_v29 = vld [vmem:[%s2786_s1 + $0x1f4] ss:$8 sps:$4 sm:$0xff]   ;;  %v1919_v30 = vld [vmem:[%s2786_s1 + $0x1f0] ss:$8 sps:$4 sm:$0xff]   ;;  %v1927_v31 = vld [vmem:[%s2786_s1 + $0x204] ss:$8 sps:$4 sm:$0xff]  }
  0x6f   :  { %736 = vmatpush1.bf16.msra.mxu0 %v1907_v15  ;;  %v1922_v32 = vld [vmem:[%s2785_s0 + $0x8] ss:$24 sps:$4 sm:$0xff]   ;;  %v1975_v34 = vld [vmem:[%s2785_s0 + $0x14] ss:$24 sps:$4 sm:$0xff]   ;;  %v1928_v36 = vld [vmem:[%s2786_s1 + $0x210] ss:$8 sps:$4 sm:$0xff]  }
  0x70   :  { %737 = vmatprep.subr.bf16.mxu0 %v1912_v17  ;;  %v1925_v33 = vld [vmem:[%s2786_s1 + $0x200] ss:$8 sps:$4 sm:$0xff]   ;;  %v1930_v35 = vld [vmem:[%s2786_s1 + $0x214] ss:$8 sps:$4 sm:$0xff]   ;;  %v1933_v37 = vld [vmem:[%s2786_s1 + $0x224] ss:$8 sps:$4 sm:$0xff]  }
  0x71   :  { %1028 = vmatpush1.bf16.msra.mxu1 %v2011_v20  ;;  %v1931_v38 = vld [vmem:[%s2786_s1 + $0x220] ss:$8 sps:$4 sm:$0xff]   ;;  %v1936_v39 = vld [vmem:[%s2786_s1 + $0x234] ss:$8 sps:$4 sm:$0xff]   ;;  %v1934_v40 = vld [vmem:[%s2786_s1 + $0x230] ss:$8 sps:$4 sm:$0xff]  }
  0x72   :  { %1029 = vmatprep.subr.bf16.mxu1 %v2012_v22  ;;  %v1939_v41 = vld [vmem:[%s2786_s1 + $0x244] ss:$8 sps:$4 sm:$0xff]   ;;  %v1937_v42 = vld [vmem:[%s2786_s1 + $0x240] ss:$8 sps:$4 sm:$0xff]   ;;  %v1942_v43 = vld [vmem:[%s2786_s1 + $0x254] ss:$8 sps:$4 sm:$0xff]  }
  0x73   :  { %738 = vmatpush1.bf16.msra.mxu0 %v1910_v19  ;;  %v1940_v44 = vld [vmem:[%s2786_s1 + $0x250] ss:$8 sps:$4 sm:$0xff]   ;;  %v1945_v45 = vld [vmem:[%s2786_s1 + $0x264] ss:$8 sps:$4 sm:$0xff]   ;;  %v1943_v46 = vld [vmem:[%s2786_s1 + $0x260] ss:$8 sps:$4 sm:$0xff]  }
  0x74   :  { %739 = vmatprep.subr.bf16.mxu0 %v1915_v21  ;;  %v1948_v47 = vld [vmem:[%s2786_s1 + $0x274] ss:$8 sps:$4 sm:$0xff]   ;;  %v1946_v48 = vld [vmem:[%s2786_s1 + $0x270] ss:$8 sps:$4 sm:$0xff]   ;;  %v1951_v49 = vld [vmem:[%s2786_s1 + $0x284] ss:$8 sps:$4 sm:$0xff]  }
  0x75   :  { %1030 = vmatpush1.bf16.msra.mxu1 %v2014_v24  ;;  %v1949_v50 = vld [vmem:[%s2786_s1 + $0x280] ss:$8 sps:$4 sm:$0xff]   ;;  %v1954_v51 = vld [vmem:[%s2786_s1 + $0x294] ss:$8 sps:$4 sm:$0xff]   ;;  %v1952_v52 = vld [vmem:[%s2786_s1 + $0x290] ss:$8 sps:$4 sm:$0xff]  }
  0x76   :  { %1031 = vmatprep.subr.bf16.mxu1 %v2015_v26  ;;  %v1957_v53 = vld [vmem:[%s2786_s1 + $0x2a4] ss:$8 sps:$4 sm:$0xff]   ;;  %v1955_v54 = vld [vmem:[%s2786_s1 + $0x2a0] ss:$8 sps:$4 sm:$0xff]   ;;  %v1960_v55 = vld [vmem:[%s2786_s1 + $0x2b4] ss:$8 sps:$4 sm:$0xff]  }
  0x77   :  { %740 = vmatpush1.bf16.msra.mxu0 %v1913_v23  ;;  %v1958_v56 = vld [vmem:[%s2786_s1 + $0x2b0] ss:$8 sps:$4 sm:$0xff]   ;;  %v1963_v57 = vld [vmem:[%s2786_s1 + $0x2c4] ss:$8 sps:$4 sm:$0xff]   ;;  %v1961_v58 = vld [vmem:[%s2786_s1 + $0x2c0] ss:$8 sps:$4 sm:$0xff]  }
  0x78   :  { %741 = vmatprep.subr.bf16.mxu0 %v1918_v25  ;;  %v1966_v59 = vld [vmem:[%s2786_s1 + $0x2d4] ss:$8 sps:$4 sm:$0xff]   ;;  %v1964_v60 = vld [vmem:[%s2786_s1 + $0x2d0] ss:$8 sps:$4 sm:$0xff]   ;;  %v1969_v61 = vld [vmem:[%s2786_s1 + $0x2e4] ss:$8 sps:$4 sm:$0xff]  }
  0x79   :  { %1032 = vmatpush1.bf16.msra.mxu1 %v2017_v28  ;;  %v1967_v62 = vld [vmem:[%s2786_s1 + $0x2e0] ss:$8 sps:$4 sm:$0xff]   ;;  %v1972_v63 = vld [vmem:[%s2786_s1 + $0x2f4] ss:$8 sps:$4 sm:$0xff]   ;;  %v1970_v0 = vld [vmem:[%s2786_s1 + $0x2f0] ss:$8 sps:$4 sm:$0xff]  }
  0x7a   :  { %v1973_v1 = vld [vmem:[%s2785_s0 + $0x10] ss:$24 sps:$4 sm:$0xff]   ;;  %v2018_v2 = vld [vmem:[%s2788_s3 + $0xe4] ss:$8 sps:$4 sm:$0xff]   ;;  %v2021_v4 = vld [vmem:[%s2788_s3 + $0xf4] ss:$8 sps:$4 sm:$0xff]  }
  0x7b   :  { %742 = vmatpush1.bf16.msra.mxu0 %v1916_v27  ;;  %v2020_v3 = vld [vmem:[%s2788_s3 + $0xe0] ss:$8 sps:$4 sm:$0xff]   ;;  %1033 = vmatprep.subr.bf16.mxu1 %v2018_v2  ;;  %v2023_v5 = vld [vmem:[%s2788_s3 + $0xf0] ss:$8 sps:$4 sm:$0xff]   ;;  %v2026_v6 = vld [vmem:[%s2792_s7 + $0x4] ss:$8 sps:$4 sm:$0xff]  }
  0x7c   :  { %743 = vmatprep.subr.bf16.mxu0 %v1921_v29  ;;  %v151_v8 = vshrl.u32 %v150_v7, 7  ;;  %v148_v10 = vld [vmem:[%s2787_s2] sm:$0x3]  ;;  %v2029_v25 = vld [vmem:[%s2792_s7 + $0x14] ss:$8 sps:$4 sm:$0xff]   ;;  %vm2119_vm0 = vmmov 0  }
  0x7d   :  { %1034 = vmatpush1.bf16.msra.mxu1 %v2020_v3  ;;  %v2024_v24 = vld [vmem:[%s2792_s7] ss:$8 sps:$4 sm:$0xff]   ;;  %v2027_v26 = vld [vmem:[%s2792_s7 + $0x10] ss:$8 sps:$4 sm:$0xff]   ;;  %v2032_v27 = vld [vmem:[%s2792_s7 + $0x24] ss:$8 sps:$4 sm:$0xff]  }
  0x7e   :  { %1035 = vmatprep.subr.bf16.mxu1 %v2021_v4  ;;  %v2596_v9 = vsub.s32 0, %v151_v8  ;;  %v2601_v11 = vsub.s32 1, %v151_v8  ;;  %v2030_v28 = vld [vmem:[%s2792_s7 + $0x20] ss:$8 sps:$4 sm:$0xff]   ;;  %v2035_v29 = vld [vmem:[%s2792_s7 + $0x34] ss:$8 sps:$4 sm:$0xff]  }
  0x7f   :  { %744 = vmatpush1.bf16.msra.mxu0 %v1919_v30  ;;  %v2033_v30 = vld [vmem:[%s2792_s7 + $0x30] ss:$8 sps:$4 sm:$0xff]   ;;  %vm1586_vm1 = vcmask 0  }
  0x80   :  { %756 = vmatprep.subr.bf16.mxu0 %v1927_v31  ;;  %v153_v12 = vrot.slane %v148_v10, %v2596_v9  ;;  %v157_v14 = vrot.slane %v148_v10, %v2601_v11  ;;  %v2038_v31 = vld [vmem:[%s2792_s7 + $0x44] ss:$8 sps:$4 sm:$0xff]  }
  0x81   :  { %1036 = vmatpush1.bf16.msra.mxu1 %v2023_v5 }
  0x82   :  { %746 = vmatmul.mubr.bf16.vlgmr.msra.gmra.mrb[0].mxu0 %v1922_v32  ;;  %1342 = vmatprep.subr.bf16.mxu1 %v2026_v6  ;;  %v2036_v32 = vld [vmem:[%s2792_s7 + $0x40] ss:$8 sps:$4 sm:$0xff]  }
  0x83   :  { %757 = vmatpush1.bf16.msra.mxu0 %v1925_v33  ;;  %788 = vmatprep.mubr.bf16.mxu0 %v1975_v34  ;;  %v2041_v33 = vld [vmem:[%s2792_s7 + $0x54] ss:$8 sps:$4 sm:$0xff]   ;;  %v2039_v34 = vld [vmem:[%s2792_s7 + $0x50] ss:$8 sps:$4 sm:$0xff]  }
  0x84   :  { %758 = vmatprep.subr.bf16.mxu0 %v1930_v35  ;;  %v2044_v35 = vld [vmem:[%s2792_s7 + $0x64] ss:$8 sps:$4 sm:$0xff]  }
  0x87   :  { %759 = vmatpush1.bf16.msra.mxu0 %v1928_v36  ;;  %v2042_v36 = vld [vmem:[%s2792_s7 + $0x60] ss:$8 sps:$4 sm:$0xff]  }
  0x88   :  { %760 = vmatprep.subr.bf16.mxu0 %v1933_v37  ;;  %v2047_v37 = vld [vmem:[%s2792_s7 + $0x74] ss:$8 sps:$4 sm:$0xff]  }
  0x8b   :  { %761 = vmatpush1.bf16.msra.mxu0 %v1931_v38  ;;  %v2045_v38 = vld [vmem:[%s2792_s7 + $0x70] ss:$8 sps:$4 sm:$0xff]  }
  0x8c   :  { %762 = vmatprep.subr.bf16.mxu0 %v1936_v39  ;;  %v2050_v39 = vld [vmem:[%s2792_s7 + $0x84] ss:$8 sps:$4 sm:$0xff]  }
  0x8f   :  { %763 = vmatpush1.bf16.msra.mxu0 %v1934_v40  ;;  %v2048_v40 = vld [vmem:[%s2792_s7 + $0x80] ss:$8 sps:$4 sm:$0xff]  }
  0x90   :  { %764 = vmatprep.subr.bf16.mxu0 %v1939_v41  ;;  %v2053_v41 = vld [vmem:[%s2792_s7 + $0x94] ss:$8 sps:$4 sm:$0xff]  }
  0x93   :  { %765 = vmatpush1.bf16.msra.mxu0 %v1937_v42  ;;  %v2051_v42 = vld [vmem:[%s2792_s7 + $0x90] ss:$8 sps:$4 sm:$0xff]  }
  0x94   :  { %766 = vmatprep.subr.bf16.mxu0 %v1942_v43  ;;  %v2056_v43 = vld [vmem:[%s2792_s7 + $0xa4] ss:$8 sps:$4 sm:$0xff]  }
  0x97   :  { %767 = vmatpush1.bf16.msra.mxu0 %v1940_v44  ;;  %v2054_v44 = vld [vmem:[%s2792_s7 + $0xa0] ss:$8 sps:$4 sm:$0xff]  }
  0x98   :  { %768 = vmatprep.subr.bf16.mxu0 %v1945_v45  ;;  %v2059_v45 = vld [vmem:[%s2792_s7 + $0xb4] ss:$8 sps:$4 sm:$0xff]  }
  0x9b   :  { %769 = vmatpush1.bf16.msra.mxu0 %v1943_v46  ;;  %v2057_v46 = vld [vmem:[%s2792_s7 + $0xb0] ss:$8 sps:$4 sm:$0xff]  }
  0x9c   :  { %770 = vmatprep.subr.bf16.mxu0 %v1948_v47  ;;  %v2062_v47 = vld [vmem:[%s2792_s7 + $0xc4] ss:$8 sps:$4 sm:$0xff]  }
  0x9f   :  { %771 = vmatpush1.bf16.msra.mxu0 %v1946_v48  ;;  %v2060_v48 = vld [vmem:[%s2792_s7 + $0xc0] ss:$8 sps:$4 sm:$0xff]  }
  0xa0   :  { %772 = vmatprep.subr.bf16.mxu0 %v1951_v49  ;;  %v2065_v49 = vld [vmem:[%s2792_s7 + $0xd4] ss:$8 sps:$4 sm:$0xff]  }
  0xa3   :  { %773 = vmatpush1.bf16.msra.mxu0 %v1949_v50  ;;  %v2063_v50 = vld [vmem:[%s2792_s7 + $0xd0] ss:$8 sps:$4 sm:$0xff]  }
  0xa4   :  { %774 = vmatprep.subr.bf16.mxu0 %v1954_v51  ;;  %v2066_v51 = vld [vmem:[%s2792_s7 + $0xe0] ss:$8 sps:$4 sm:$0xff]  }
  0xa7   :  { %775 = vmatpush1.bf16.msra.mxu0 %v1952_v52  ;;  %v2068_v52 = vld [vmem:[%s2792_s7 + $0xe4] ss:$8 sps:$4 sm:$0xff]  }
  0xa8   :  { %776 = vmatprep.subr.bf16.mxu0 %v1957_v53  ;;  %v2071_v53 = vld [vmem:[%s2792_s7 + $0xf4] ss:$8 sps:$4 sm:$0xff]  }
  0xab   :  { %777 = vmatpush1.bf16.msra.mxu0 %v1955_v54  ;;  %v2069_v54 = vld [vmem:[%s2792_s7 + $0xf0] ss:$8 sps:$4 sm:$0xff]  }
  0xac   :  { %778 = vmatprep.subr.bf16.mxu0 %v1960_v55  ;;  %v833_v55 = vld [vmem:[%s2789_s4] sm:$0x3] }
  0xaf   :  { %779 = vmatpush1.bf16.msra.mxu0 %v1958_v56  ;;  %v838_v56 = vrot.slane %v833_v55, %v2596_v9 }
  0xb0   :  { %780 = vmatprep.subr.bf16.mxu0 %v1963_v57  ;;  %v842_v57 = vrot.slane %v833_v55, %v2601_v11 }
  0xb3   :  { %781 = vmatpush1.bf16.msra.mxu0 %v1961_v58 }
  0xb4   :  { %782 = vmatprep.subr.bf16.mxu0 %v1966_v59 }
  0xb7   :  { %783 = vmatpush1.bf16.msra.mxu0 %v1964_v60 }
  0xb8   :  { %784 = vmatprep.subr.bf16.mxu0 %v1969_v61 }
  0xbb   :  { %785 = vmatpush1.bf16.msra.mxu0 %v1967_v62 }
  0xbc   :  { %786 = vmatprep.subr.bf16.mxu0 %v1972_v63 }
  0xbf   :  { %787 = vmatpush1.bf16.msra.mxu0 %v1970_v0 }
  0xc2   :  { %789 = vmatmul.mubr.bf16.vlgmr.msra.gmra.mrb[0].mxu0 %v1973_v1 }
 0x195   :  { %v790_v13 = vpop.f32.mrb[0].mxu0 }
 0x196   :  { %v792_v15 = vpop.f32.mrb[1].mxu0  ;;  %v1808_v17 = vadd.f32 %v790_v13, %v153_v12 }
 0x197   :  { %v794_v16 = vpop.f32.mrb[2].mxu0  ;;  %v1809_v20 = vadd.f32 %v792_v15, %v157_v14 }
 0x198   :  { %v1810_v18 = vadd.f32 %v794_v16, %v153_v12  ;;  %v796_v19 = vpop.f32.mrb[3].mxu0 }
 0x199   :  { %v1811_v21 = vadd.f32 %v796_v19, %v157_v14 }
 0x19a   :  { %v799_v22 = vpack.c.bf16 %v1810_v18, %v1808_v17 }
 0x19b   :  { %v800_v23 = vpack.c.bf16 %v1811_v21, %v1809_v20 }
 0x19d   :  { %1037 = vmatprep.mubr.bf16.mxu1 %v800_v23 }
 0x19e   :  { %1038 = vmatmul.mubr.bf16.vlgmr.msra.gmra.mrb[0].mxu1 %v799_v22 }
 0x19f   :  { %1343 = vmatpush1.bf16.msra.mxu1 %v2024_v24 }
 0x1a0   :  { %1344 = vmatprep.subr.bf16.mxu1 %v2029_v25 }
 0x1a3   :  { %1345 = vmatpush1.bf16.msra.mxu1 %v2027_v26 }
 0x1a4   :  { %1346 = vmatprep.subr.bf16.mxu1 %v2032_v27 }
 0x1a7   :  { %1347 = vmatpush1.bf16.msra.mxu1 %v2030_v28 }
 0x1a8   :  { %1348 = vmatprep.subr.bf16.mxu1 %v2035_v29 }
 0x1ab   :  { %1349 = vmatpush1.bf16.msra.mxu1 %v2033_v30 }
 0x1ac   :  { %1350 = vmatprep.subr.bf16.mxu1 %v2038_v31 }
 0x1af   :  { %1351 = vmatpush1.bf16.msra.mxu1 %v2036_v32 }
 0x1b0   :  { %1352 = vmatprep.subr.bf16.mxu1 %v2041_v33 }
 0x1b3   :  { %1353 = vmatpush1.bf16.msra.mxu1 %v2039_v34 }
 0x1b4   :  { %1354 = vmatprep.subr.bf16.mxu1 %v2044_v35 }
 0x1b7   :  { %1355 = vmatpush1.bf16.msra.mxu1 %v2042_v36 }
 0x1b8   :  { %1356 = vmatprep.subr.bf16.mxu1 %v2047_v37 }
 0x1bb   :  { %1357 = vmatpush1.bf16.msra.mxu1 %v2045_v38 }
 0x1bc   :  { %1358 = vmatprep.subr.bf16.mxu1 %v2050_v39 }
 0x1bf   :  { %1359 = vmatpush1.bf16.msra.mxu1 %v2048_v40 }
 0x1c0   :  { %1360 = vmatprep.subr.bf16.mxu1 %v2053_v41 }
 0x1c3   :  { %1361 = vmatpush1.bf16.msra.mxu1 %v2051_v42 }
 0x1c4   :  { %1362 = vmatprep.subr.bf16.mxu1 %v2056_v43 }
 0x1c7   :  { %1363 = vmatpush1.bf16.msra.mxu1 %v2054_v44 }
 0x1c8   :  { %1364 = vmatprep.subr.bf16.mxu1 %v2059_v45 }
 0x1cb   :  { %1365 = vmatpush1.bf16.msra.mxu1 %v2057_v46 }
 0x1cc   :  { %1366 = vmatprep.subr.bf16.mxu1 %v2062_v47 }
 0x1cf   :  { %1367 = vmatpush1.bf16.msra.mxu1 %v2060_v48 }
 0x1d0   :  { %1368 = vmatprep.subr.bf16.mxu1 %v2065_v49 }
 0x1d3   :  { %1369 = vmatpush1.bf16.msra.mxu1 %v2063_v50  ;;  %v1048_v50 = vld [vmem:[%s2790_s5] sm:$0x3] }
 0x1d4   :  { %1370 = vmatprep.subr.bf16.mxu1 %v2068_v52  ;;  %v1106_v52 = vrot.slane %v1048_v50, %v2596_v9 }
 0x1d7   :  { %1371 = vmatpush1.bf16.msra.mxu1 %v2066_v51  ;;  %v1049_v51 = vld [vmem:[%s2791_s6] sm:$0x3] }
 0x1d8   :  { %1372 = vmatprep.subr.bf16.mxu1 %v2071_v53 }
 0x1db   :  { %1373 = vmatpush1.bf16.msra.mxu1 %v2069_v54  ;;  %v1110_v54 = vrot.slane %v1048_v50, %v2601_v11 }
 0x271   :  { %v1039_v58 = vpop.f32.mrb[0].mxu1 }
 0x272   :  { %v2703_v59 = vadd.f32 %v1039_v58, %v838_v56  ;;  %v1041_v60 = vpop.f32.mrb[1].mxu1 }
 0x273   :  { %v2705_v61 = vadd.f32 %v1041_v60, %v842_v57  ;;  %v1043_v62 = vpop.f32.mrb[2].mxu1 }
 0x274   :  { %v1044_v63 = vadd.f32 %v1043_v62, %v838_v56  ;;  %v1045_v0 = vpop.f32.mrb[3].mxu1  ;;  %v1066_v2 = vmul.f32 %v2703_v59, %v2703_v59 }
 0x275   :  { %v1046_v1 = vadd.f32 %v1045_v0, %v842_v57  ;;  %v1067_v5 = vmul.f32 %v2705_v61, %v2705_v61  ;;  %v1121_v57 = vrot.slane %v1049_v51, %v2596_v9 }
 0x276   :  { %v1050_v3 = vadd.f32 %v1044_v63, %v2703_v59  ;;  %v1068_v4 = vmul.f32 %v1044_v63, %v1044_v63 }
 0x277   :  { %v1057_v6 = vadd.f32 %v1046_v1, %v2705_v61  ;;  %v1069_v7 = vmul.f32 %v1046_v1, %v1046_v1 }
 0x278   :  { %v1051_v8 = vrot.slane %v1050_v3, 4  ;;  %v1070_v10 = vadd.f32 %v1068_v4, %v1066_v2 }
 0x279   :  { %v1058_v12 = vrot.slane %v1057_v6, 4  ;;  %v1077_v13 = vadd.f32 %v1069_v7, %v1067_v5 }
 0x27a   :  { %v1052_v14 = vadd.f32 %v1051_v8, %v1050_v3  ;;  %v1071_v15 = vrot.slane %v1070_v10, 4 }
 0x27b   :  { %v1059_v16 = vadd.f32 %v1058_v12, %v1057_v6  ;;  %v1078_v17 = vrot.slane %v1077_v13, 4 }
 0x27c   :  { %v1053_v18 = vrot.slane %v1052_v14, 2  ;;  %v1072_v19 = vadd.f32 %v1071_v15, %v1070_v10  ;;  %v2118_v15 = vmov 0.0  }
 0x27d   :  { %v1060_v20 = vrot.slane %v1059_v16, 2  ;;  %v1079_v21 = vadd.f32 %v1078_v17, %v1077_v13  ;;  %1788 = vmatprep.subr.bf16.mxu1 %v2118_v15  ;;  %v2074_v17 = vld [vmem:[%s2796_s11 + $0x10] sm:$0xff]  }
 0x27e   :  { %v1054_v22 = vadd.f32 %v1053_v18, %v1052_v14  ;;  %v1073_v23 = vrot.slane %v1072_v19, 2  ;;  %v2072_v14 = vld [vmem:[%s2796_s11] sm:$0xff]   ;;  %v2075_v18 = vld [vmem:[%s2796_s11 + $0x18] sm:$0xff]  }
 0x27f   :  { %v1061_v24 = vadd.f32 %v1060_v20, %v1059_v16  ;;  %v1080_v25 = vrot.slane %v1079_v21, 2  ;;  %v2073_v16 = vld [vmem:[%s2796_s11 + $0x8] sm:$0xff]  }
 0x280   :  { %v1055_v26 = vrot.slane %v1054_v22, 1  ;;  %v1074_v27 = vadd.f32 %v1073_v23, %v1072_v19  ;;  %v2076_v19 = vld [vmem:[%s2796_s11 + $0x20] sm:$0xff]   ;;  %v2077_v20 = vld [vmem:[%s2796_s11 + $0x28] sm:$0xff]  }
 0x281   :  { %v1062_v28 = vrot.slane %v1061_v24, 1  ;;  %v1081_v29 = vadd.f32 %v1080_v25, %v1079_v21  ;;  %v2078_v21 = vld [vmem:[%s2796_s11 + $0x30] sm:$0xff]   ;;  %v1170_v23 = vld [vmem:[%s2793_s8] sm:$0x3] }
 0x282   :  { %v1056_v30 = vadd.f32 %v1055_v26, %v1054_v22  ;;  %v1075_v31 = vrot.slane %v1074_v27, 1  ;;  %v2079_v22 = vld [vmem:[%s2796_s11 + $0x38] sm:$0xff]   ;;  %v1179_v25 = vrot.slane %v1170_v23, %v2601_v11 }
 0x283   :  { %v1063_v32 = vadd.f32 %v1062_v28, %v1061_v24  ;;  %v1082_v33 = vrot.slane %v1081_v29, 1  ;;  %v1175_v24 = vrot.slane %v1170_v23, %v2596_v9 }
 0x284   :  { %v1064_v34 = vmul.f32 0.0625, %v1056_v30  ;;  %v1076_v35 = vadd.f32 %v1075_v31, %v1074_v27 }
 0x285   :  { %v1065_v36 = vmul.f32 0.0625, %v1063_v32  ;;  %v1083_v37 = vadd.f32 %v1082_v33, %v1081_v29 }
 0x286   :  { %v1084_v38 = vmul.f32 0.0625, %v1076_v35  ;;  %v1086_v39 = vmul.f32 %v1064_v34, %v1064_v34  ;;  %v1090_v40 = vsub.f32 %v2703_v59, %v1064_v34  ;;  %v1092_v41 = vsub.f32 %v1044_v63, %v1064_v34 }
 0x287   :  { %v1085_v42 = vmul.f32 0.0625, %v1083_v37  ;;  %v1087_v43 = vmul.f32 %v1065_v36, %v1065_v36  ;;  %v1093_v44 = vsub.f32 %v1046_v1, %v1065_v36  ;;  %v1091_v45 = vsub.f32 %v2705_v61, %v1065_v36 }
 0x288   :  { %v1088_v46 = vsub.f32 %v1084_v38, %v1086_v39  ;;  %v1125_v61 = vrot.slane %v1049_v51, %v2601_v11 }
 0x289   :  { %v1089_v47 = vsub.f32 %v1085_v42, %v1087_v43 }
 0x28a   :  { %v1094_v48 = vadd.f32 1e-05, %v1088_v46 }
 0x28b   :  { %v1095_v49 = vadd.f32 1e-05, %v1089_v47 }
 0x28c   :  { %2080 = vrsqrt.f32 %v1094_v48 }
 0x28d   :  { %2082 = vrsqrt.f32 %v1095_v49 }
 0x296   :  { %v2081_v53 = vpop.eup %2080 }
 0x297   :  { %v2083_v55 = vpop.eup %2082  ;;  %v1100_v56 = vmul.f32 %v2081_v53, %v1092_v41  ;;  %v1098_v58 = vmul.f32 %v2081_v53, %v1090_v40 }
 0x298   :  { %v1101_v59 = vmul.f32 %v2083_v55, %v1093_v44  ;;  %v1099_v60 = vmul.f32 %v2083_v55, %v1091_v45 }
 0x299   :  { %v1115_v62 = vmul.f32 %v1106_v52, %v1100_v56  ;;  %v1113_v63 = vmul.f32 %v1106_v52, %v1098_v58  ;;  %v1768_v58 = vld [vmem:[%s2794_s9] ss:$0 sm:$0xff]  ;;  %s2120_s9 = smov [#allocation2]  }
 0x29a   :  { %v1114_v0 = vmul.f32 %v1110_v54, %v1099_v60  ;;  %v1116_v1 = vmul.f32 %v1110_v54, %v1101_v59 }
 0x29b   :  { %v1128_v2 = vadd.f32 %v1121_v57, %v1113_v63  ;;  %v1130_v3 = vadd.f32 %v1121_v57, %v1115_v62 }
 0x29c   :  { %v1129_v4 = vadd.f32 %v1125_v61, %v1114_v0  ;;  %v1131_v5 = vadd.f32 %v1125_v61, %v1116_v1  ;;  %v1769_v61 = vld [vmem:[%s2795_s10] ss:$0 sm:$0xff]  ;;  %s1594_s10 = sshll.u32 %s2120_s9, 4  ;;  %s1595_s10 = int_to_ptr.vmem [resolvable:$true] %s1594_s10 }
 0x29d   :  { %v1132_v6 = vmax.f32 %v1128_v2, 0.0  ;;  %v1134_v7 = vmax.f32 %v1130_v3, 0.0  ;;  %s2098_s7 = scalar_lea.vmem %s1595_s10, 32  ;;  %p2099_p1 = scmp.lt.s32.totalorder %s1595_s10, %s1595_s10 }
 0x29e   :  { %v1133_v8 = vmax.f32 %v1129_v4, 0.0  ;;  %v1135_v10 = vmax.f32 %v1131_v5, 0.0  ;;  %v1770_v5 = vld [vmem:[%s2797_s12] ss:$0 sm:$0xff]  ;;  %s2094_s12 = scalar_lea.vmem %s1595_s10, 16 }
 0x29f   :  { %v1136_v12 = vpack.c.bf16 %v1134_v7, %v1132_v6  ;;  %p2095_p0 = scmp.ne.s32.totalorder %s1595_s10, %s2094_s12  ;;  %p2100_p2 = scmp.lt.s32.totalorder %s2098_s7, %s2094_s12 }
 0x2a0   :  { %v1137_v13 = vpack.c.bf16 %v1135_v10, %v1133_v8 }
 0x2a1   :  { %p2101_p3 = por %p2100_p2, %p2099_p1 }
 0x2a2   :  { %1374 = vmatprep.mubr.bf16.mxu1 %v1137_v13 }
 0x2a3   :  { %1375 = vmatmul.mubr.bf16.vlgmr.msra.gmra.mrb[4].mxu1 %v1136_v12  ;;  %p2102_p4 = pnand %p2101_p3, %p2095_p0 }
 0x2a4   :  { %1789 = vmatpush3.bf16.msra.mxu1 %v2072_v14  ;;  %1804 = vmatprep.mubr.msk.bf16.mxu1 %vm2119_vm0, %v2118_v15 }
 0x2a5   :  { %1790 = vmatprep.subr.bf16.mxu1 %v2118_v15 }
 0x2a8   :  { %1791 = vmatpush3.bf16.msra.mxu1 %v2073_v16 }
 0x2a9   :  { %1792 = vmatprep.subr.bf16.mxu1 %v2118_v15 }
 0x2ac   :  { %1793 = vmatpush3.bf16.msra.mxu1 %v2074_v17 }
 0x2ad   :  { %1794 = vmatprep.subr.bf16.mxu1 %v2118_v15 }
 0x2b0   :  { %1795 = vmatpush3.bf16.msra.mxu1 %v2075_v18 }
 0x2b1   :  { %1796 = vmatprep.subr.bf16.mxu1 %v2118_v15 }
 0x2b4   :  { %1797 = vmatpush3.bf16.msra.mxu1 %v2076_v19 }
 0x2b5   :  { %1798 = vmatprep.subr.bf16.mxu1 %v2118_v15 }
 0x2b8   :  { %1799 = vmatpush3.bf16.msra.mxu1 %v2077_v20 }
 0x2b9   :  { %1800 = vmatprep.subr.bf16.mxu1 %v2118_v15 }
 0x2bc   :  { %1801 = vmatpush3.bf16.msra.mxu1 %v2078_v21 }
 0x2bd   :  { %1802 = vmatprep.subr.bf16.mxu1 %v2118_v15 }
 0x2c0   :  { %1803 = vmatpush3.bf16.msra.mxu1 %v2079_v22 }
 0x376   :  { %v1376_v26 = vpop.f32.mrb[4].mxu1 }
 0x377   :  { %v1377_v27 = vadd.f32 %v1376_v26, %v1175_v24  ;;  %v1378_v28 = vpop.f32.mrb[5].mxu1 }
 0x378   :  { %v2754_v29 = vadd.f32 %v1378_v28, %v1179_v25  ;;  %v1380_v30 = vpop.f32.mrb[6].mxu1 }
 0x379   :  { %v1381_v31 = vadd.f32 %v1380_v30, %v1175_v24  ;;  %v1382_v32 = vpop.f32.mrb[7].mxu1  ;;  %v1395_v35 = vmul.f32 %v1377_v27, %v1377_v27 }
 0x37a   :  { %v2756_v33 = vadd.f32 %v1382_v32, %v1179_v25  ;;  %v1556_v34 = vmul.f32 %v2754_v29, %v2754_v29 }
 0x37b   :  { %v1387_v36 = vadd.f32 %v1381_v31, %v1377_v27  ;;  %v1396_v37 = vmul.f32 %v1381_v31, %v1381_v31 }
 0x37c   :  { %1558 = vadd.xlane.f32.xlu1 %v1556_v34  ;;  %v1557_v11 = vmul.f32 %v2756_v33, %v2756_v33 }
 0x37d   :  { %v1388_v9 = vrot.slane %v1387_v36, 4  ;;  %v1397_v38 = vadd.f32 %v1396_v37, %v1395_v35 }
 0x37f   :  { %v1389_v39 = vadd.f32 %v1388_v9, %v1387_v36  ;;  %v1398_v40 = vrot.slane %v1397_v38, 4 }
 0x380   :  { %1560 = vadd.xlane.f32.xlu1 %v1557_v11 }
 0x381   :  { %v1390_v41 = vrot.slane %v1389_v39, 2  ;;  %v1399_v42 = vadd.f32 %v1398_v40, %v1397_v38 }
 0x383   :  { %v1391_v43 = vadd.f32 %v1390_v41, %v1389_v39  ;;  %v1400_v44 = vrot.slane %v1399_v42, 2 }
 0x385   :  { %v1392_v45 = vrot.slane %v1391_v43, 1  ;;  %v1401_v46 = vadd.f32 %v1400_v44, %v1399_v42 }
 0x387   :  { %v1393_v47 = vadd.f32 %v1392_v45, %v1391_v43  ;;  %v1402_v48 = vrot.slane %v1401_v46, 1 }
 0x389   :  { %v1394_v49 = vmul.f32 0.0625, %v1393_v47  ;;  %v1403_v50 = vadd.f32 %v1402_v48, %v1401_v46 }
 0x38b   :  { %v1404_v51 = vmul.f32 0.0625, %v1403_v50  ;;  %v1405_v52 = vmul.f32 %v1394_v49, %v1394_v49  ;;  %v1407_v53 = vsub.f32 %v1377_v27, %v1394_v49  ;;  %v1408_v54 = vsub.f32 %v1381_v31, %v1394_v49 }
 0x38d   :  { %v1406_v55 = vsub.f32 %v1404_v51, %v1405_v52 }
 0x38f   :  { %v1409_v56 = vadd.f32 1e-05, %v1406_v55 }
 0x391   :  { %2084 = vrsqrt.f32 %v1409_v56 }
 0x39b   :  { %v2085_v57 = vpop.eup %2084 }
 0x39c   :  { %v1411_v59 = vmul.f32 %v2085_v57, %v1407_v53  ;;  %v1412_v60 = vmul.f32 %v2085_v57, %v1408_v54 }
 0x39e   :  { %v1419_v62 = vmul.f32 %v1768_v58, %v1411_v59  ;;  %v1420_v63 = vmul.f32 %v1768_v58, %v1412_v60 }
 0x3a0   :  { %v1427_v0 = vadd.f32 %v1769_v61, %v1419_v62  ;;  %v1428_v1 = vadd.f32 %v1769_v61, %v1420_v63 }
 0x3a2   :  { %v1429_v2 = vmax.f32 %v1427_v0, 0.0  ;;  %v1430_v3 = vmax.f32 %v1428_v1, 0.0 }
 0x3a4   :  { %v1431_v4 = vpack.c.bf16 %v1430_v3, %v1429_v2 }
 0x3a6   :  { %1805 = vmatmul.mubr.bf16.vlgmr.msra.gmra.mrb[8].mxu1 %v1431_v4 }
 0x409   :  { %v1559_v16 = vpop.xlane.xlu1 %1558 }
 0x40a   :  { %v1562_v17 = vmax.f32 %v1559_v16, 1e-24 }
 0x40c   :  { %2086 = vrsqrt.f32 %v1562_v17 }
 0x40d   :  { %v1561_v18 = vpop.xlane.xlu1 %1560 }
 0x40e   :  { %v1563_v20 = vmax.f32 %v1561_v18, 1e-24 }
 0x416   :  { %v2087_v24 = vpop.eup %2086 }
 0x417   :  { %v1566_v27 = vmul.f32 %v2087_v24, %v2754_v29 }
 0x479   :  { %v1537_v6 = vpop.f32.mrb[8].mxu1 }
 0x47a   :  { %v1538_v7 = vadd.f32 %v1770_v5, %v1537_v6  ;;  %v1806_v8 = vpop.f32.mrb[9].mxu1 }
 0x47b   :  { %v1540_v10 = vpop.f32.mrb[10].mxu1 }
 0x47c   :  { %v1541_v12 = vadd.f32 %v1770_v5, %v1540_v10  ;;  %v1807_v13 = vpop.f32.mrb[11].mxu1  ;;  %v1544_v14 = vmul.f32 %v1538_v7, %v1538_v7 }
 0x47e   :  { %1546 = vadd.xlane.f32.xlu0 %v1544_v14  ;;  %v1545_v15 = vmul.f32 %v1541_v12, %v1541_v12 }
 0x482   :  { %1548 = vadd.xlane.f32.xlu0 %v1545_v15 }
 0x50b   :  { %v1547_v19 = vpop.xlane.xlu0 %1546 }
 0x50c   :  { %v1550_v21 = vmax.f32 %v1547_v19, 1e-24 }
 0x50e   :  { %2088 = vrsqrt.f32 %v1550_v21 }
 0x50f   :  { %v1549_v22 = vpop.xlane.xlu0 %1548  ;;  %2090 = vrsqrt.f32 %v1563_v20 }
 0x510   :  { %v1551_v23 = vmax.f32 %v1549_v22, 1e-24 }
 0x512   :  { %2092 = vrsqrt.f32 %v1551_v23 }
 0x518   :  { %v2089_v25 = vpop.eup %2088 }
 0x519   :  { %v1554_v26 = vmul.f32 %v2089_v25, %v1538_v7  ;;  %v2091_v28 = vpop.eup %2090 }
 0x51a   :  { %v1567_v34 = vmul.f32 %v2091_v28, %v2756_v33 }
 0x51b   :  { %v1568_v30 = vmul.f32 %v1566_v27, %v1554_v26 }
 0x51c   :  { %v2093_v31 = vpop.eup %2092 }
 0x51d   :  { %1570 = vadd.xlane.f32.xlu0 %v1568_v30  ;;  %v1555_v32 = vmul.f32 %v2093_v31, %v1541_v12 }
 0x51f   :  { %v1569_v35 = vmul.f32 %v1567_v34, %v1555_v32 }
 0x521   :  { %1572 = vadd.xlane.f32.xlu1 %v1569_v35 }
 0x5aa   :  { %v1571_v36 = vpop.xlane.xlu0 %1570 }
 0x5ab   :  { %v1574_v37 = vmul.f32 2.0, %v1571_v36 }
 0x5ad   :  { %v1576_v11 = vsub.f32 2.0, %v1574_v37 }
 0x5ae   :  { %v1573_v9 = vpop.xlane.xlu1 %1572 }
 0x5af   :  { %v1575_v38 = vmul.f32 2.0, %v1573_v9 }
 0x5b1   :  { %v1577_v39 = vsub.f32 2.0, %v1575_v38 }
 0x5b3   :  { %v1578_v40 = vadd.f32 %v1577_v39, %v1576_v11 }
 0x5b5   :  { %v1579_v41 = vrot.slane %v1578_v40, 4 }
 0x5b7   :  { %v1580_v42 = vadd.f32 %v1579_v41, %v1578_v40 }
 0x5b9   :  { %v1581_v43 = vrot.slane %v1580_v42, 2 }
 0x5bb   :  { %v1582_v29 = vadd.f32 %v1581_v43, %v1580_v42 }
 0x5bd   :  { %v1583_v44 = vrot.slane %v1582_v29, 1 }
 0x5bf   :  { %v1584_v45 = vadd.f32 %v1583_v44, %v1582_v29 }
 0x5c1   :  { %v1585_v46 = vmul.f32 0.125, %v1584_v45 }
 0x5c3   :  { %1587 = vst.msk [vmem:[#allocation2] sm:$0x1] %vm1586_vm1, %v1585_v46 }
 0x5c4   :  { %2105 = shalt.err (!%p2102_p4)
}
 0x5c5   :  { %s2106_s5 = scalar_lea.hbm %s2798_s13, 16 }
 0x5c6   :  { %p2107_p5 = scmp.ne.s32.totalorder %s2798_s13, %s2106_s5  ;;  %p2110_p6 = scmp.lt.u32.totalorder %s2106_s5, %s2798_s13 }
 0x5c8   :  { %p2112_p7 = pnand %p2110_p6, %p2107_p5 }
 0x5ca   :  { %2115 = shalt.err (!%p2112_p7)
}
 0x5cb   :  { %1597 = dma.vmem_to_hbm [thread:$0]  %s1595_s10, 16, %s2798_s13, [#allocation3]  }
 0x5cc   :  { %2116 = dma.done.wait [#allocation3], 16  }
 0x5cd   :  { %2117 = vsyncadd [#allocation3], 4294967280 }
 0x5ce   :  { %1601 = vsyncpa [#allocation3], 1 }

</bundles_post_ra>
